<compile_context>
chip_gen: v5e
topology: v5e:2x2
jax: 0.10.0
libtpu: 0.0.40
codegen_flags: <defaults>
</compile_context>

<pallas_src>
import jax
import jax.numpy as jnp
from jax.experimental import pallas as pl
from jax.experimental.pallas import tpu as pltpu


def mlp_kernel(x_ref, w1_ref, b1_ref, w2_ref, b2_ref, w3_ref, b3_ref, o_ref):
    # Fused 3-layer MLP on one batch tile.  Weights/biases are VMEM-resident
    # across the whole batch grid (index_map always returns block (0, 0)).
    x = x_ref[...].astype(jnp.bfloat16)                                 # f32 -> bf16 on VPU (free)
    h1 = jnp.dot(x, w1_ref[...], preferred_element_type=jnp.float32)   # MXU, f32 accumulate
    h1 = jnp.maximum(h1 + b1_ref[...], 0.0)                             # F.relu(fc1(x)), f32
    h2 = jnp.dot(h1.astype(w2_ref.dtype), w2_ref[...],
                 preferred_element_type=jnp.float32)
    h2 = jnp.maximum(h2 + b2_ref[...], 0.0)                             # F.relu(fc2(x)), f32
    y = jnp.dot(h2.astype(w3_ref.dtype), w3_ref[...],
                preferred_element_type=jnp.float32)
    o_ref[...] = (y + b3_ref[...]).astype(o_ref.dtype)                  # fc3(x): (tm, D_out) f32


def _round_up(n, m):
    return ((n + m - 1) // m) * m


def _choose_tiling(batch, *, max_tile=2048, split=2):
    """Pick (tile_rows, padded_batch).

    Rows are padded only to the 8-sublane granule.  Batches above 256*split rows
    are split into a multiple of `split` near-equal tiles so v7x's two
    TensorCores both get work (grid axis is "parallel"); tiles are capped at
    `max_tile` rows to stay comfortably inside VMEM on every generation.
    """
    b8 = _round_up(max(batch, 8), 8)
    if b8 <= 256 * split:
        return b8, b8                       # single tile, minimal padding
    n = split
    while _round_up(pl.cdiv(b8, n), 8) > max_tile:
        n += split
    tm = _round_up(pl.cdiv(b8, n), 8)
    return tm, tm * n


def prepare_params(w1, b1, w2, b2, w3, b3):
    """One-time parameter prep (hoisted out of the forward path).

    Weights pre-transposed to (in, out) and cast to bf16 (native MXU dtype,
    halves weight DMA bytes); biases kept f32, shaped (1, out).
    """
    return (w1.astype(jnp.bfloat16), b1.reshape(1, -1).astype(jnp.float32),
            w2.astype(jnp.bfloat16), b2.reshape(1, -1).astype(jnp.float32),
            w3.astype(jnp.bfloat16), b3.reshape(1, -1).astype(jnp.float32))


def mlp_forward(x, params, *, max_tile=2048):
    """x: (B, D_in) f32.  params: output of prepare_params()."""
    w1, b1, w2, b2, w3, b3 = params
    B, D_in = x.shape
    D_h1 = w1.shape[1]
    D_h2 = w2.shape[1]
    D_out = w3.shape[1]

    tm, B_pad = _choose_tiling(B, max_tile=max_tile)
    if B_pad != B:
        x = jnp.pad(x, ((0, B_pad - B), (0, 0)))

    out = pl.pallas_call(
        mlp_kernel,
        out_shape=jax.ShapeDtypeStruct((B_pad, D_out), jnp.float32),
        grid=(B_pad // tm,),
        in_specs=[
            pl.BlockSpec((tm, D_in), lambda i: (i, 0)),     # x: tiled over batch (f32)
            pl.BlockSpec((D_in, D_h1), lambda i: (0, 0)),   # weights/biases: VMEM-resident
            pl.BlockSpec((1, D_h1), lambda i: (0, 0)),
            pl.BlockSpec((D_h1, D_h2), lambda i: (0, 0)),
            pl.BlockSpec((1, D_h2), lambda i: (0, 0)),
            pl.BlockSpec((D_h2, D_out), lambda i: (0, 0)),
            pl.BlockSpec((1, D_out), lambda i: (0, 0)),
        ],
        out_specs=pl.BlockSpec((tm, D_out), lambda i: (i, 0)),  # unpadded, exact HBM bytes
        compiler_params=pltpu.CompilerParams(
            dimension_semantics=("parallel",),          # shard batch tiles across TCs (v7x)
            vmem_limit_bytes=32 * 1024 * 1024,          # safe on all generations
        ),
    )(x, w1, b1, w2, b2, w3, b3)

    return out[:B] if B_pad != B else out


def ref_forward(x, params):
    # Pure-JAX reference performing the SAME bf16-input / f32-accumulate math.
    w1, b1, w2, b2, w3, b3 = params
    h1 = jnp.dot(x.astype(jnp.bfloat16), w1, preferred_element_type=jnp.float32) + b1
    h1 = jnp.maximum(h1, 0.0)
    h2 = jnp.dot(h1.astype(jnp.bfloat16), w2, preferred_element_type=jnp.float32) + b2
    h2 = jnp.maximum(h2, 0.0)
    return jnp.dot(h2.astype(jnp.bfloat16), w3, preferred_element_type=jnp.float32) + b3


if __name__ == "__main__":
    # Module hyperparameters (small, consistent with __init__):
    #   input_dimensions -> len 4, state_dimensions -> len 4,
    #   output_dimensions -> len 2, history_size -> 3
    # => fc1 input dim = input_size*(history_size-1) + state_size = 4*2 + 4 = 12
    input_size, state_size, output_size, history_size = 4, 4, 2, 3
    d_in = input_size * (history_size - 1) + state_size   # 12
    d_h1, d_h2 = 256, 64
    batch = 8

    key = jax.random.PRNGKey(0)
    kx, k1, k2, k3, k4, k5, k6, kx2 = jax.random.split(key, 8)

    # Deterministic parameter init (Kaiming-uniform-like bounds, nn.Linear shapes,
    # stored pre-transposed as (in, out) so the kernel computes x @ W + b).
    def linear_params(kw, kb, fan_in, fan_out):
        bound = 1.0 / jnp.sqrt(fan_in)
        w = jax.random.uniform(kw, (fan_in, fan_out), jnp.float32, -bound, bound)
        b = jax.random.uniform(kb, (1, fan_out), jnp.float32, -bound, bound)
        return w, b

    w1, b1 = linear_params(k1, k2, d_in, d_h1)
    w2, b2 = linear_params(k3, k4, d_h1, d_h2)
    w3, b3 = linear_params(k5, k6, d_h2, output_size)

    # One-time weight prep (bf16 casts), hoisted out of the forward path.
    params = jax.tree_util.tree_map(jax.block_until_ready,
                                    prepare_params(w1, b1, w2, b2, w3, b3))

    # --- Small-batch check (single grid step, tm = 8, no padding).
    x = jax.random.normal(kx, (batch, d_in), dtype=jnp.float32)
    out = mlp_forward(x, params)
    jax.block_until_ready(out)
    ref = ref_forward(x, params)
    assert out.shape == (batch, output_size)
    assert jnp.allclose(out, ref, atol=5e-3, rtol=5e-3)

    # --- Multi-tile check: B=600 -> two 304-row tiles (even grid for v7x's 2 TCs,
    #     only 8 padded rows), resident weights reused across steps.
    big_batch = 600
    x2 = jax.random.normal(kx2, (big_batch, d_in), dtype=jnp.float32)
    out2 = mlp_forward(x2, params)
    jax.block_until_ready(out2)
    ref2 = ref_forward(x2, params)
    assert out2.shape == (big_batch, output_size)
    assert jnp.allclose(out2, ref2, atol=5e-3, rtol=5e-3)

    print("KERNEL_OK")
</pallas_src>

<mosaic_0001>
module attributes {stable_mosaic.version = 11 : i64} {
  func.func @mlp_kernel(%arg0: i32, %arg1: memref<8x12xf32, #tpu.memory_space<vmem>>, %arg2: memref<12x256xbf16, #tpu.memory_space<vmem>>, %arg3: memref<1x256xf32, #tpu.memory_space<vmem>>, %arg4: memref<256x64xbf16, #tpu.memory_space<vmem>>, %arg5: memref<1x64xf32, #tpu.memory_space<vmem>>, %arg6: memref<64x2xbf16, #tpu.memory_space<vmem>>, %arg7: memref<1x2xf32, #tpu.memory_space<vmem>>, %arg8: memref<8x2xf32, #tpu.memory_space<vmem>>) attributes {dimension_semantics = [#tpu.dimension_semantics<parallel>], iteration_bounds = array<i64: 1>, scalar_prefetch = 0 : i64, scratch_operands = 0 : i64, tpu.core_type = #tpu.core_type<tc>, window_params = [{transform_indices = @transform_0, window_bounds = array<i64: 8, 12>}, {pipeline_mode = #tpu.pipeline_mode<synchronous>, transform_indices = @transform_1, window_bounds = array<i64: 12, 256>}, {pipeline_mode = #tpu.pipeline_mode<synchronous>, transform_indices = @transform_2, window_bounds = array<i64: 1, 256>}, {pipeline_mode = #tpu.pipeline_mode<synchronous>, transform_indices = @transform_3, window_bounds = array<i64: 256, 64>}, {pipeline_mode = #tpu.pipeline_mode<synchronous>, transform_indices = @transform_4, window_bounds = array<i64: 1, 64>}, {pipeline_mode = #tpu.pipeline_mode<synchronous>, transform_indices = @transform_5, window_bounds = array<i64: 64, 2>}, {pipeline_mode = #tpu.pipeline_mode<synchronous>, transform_indices = @transform_6, window_bounds = array<i64: 1, 2>}, {transform_indices = @transform_7, window_bounds = array<i64: 8, 2>}]} {
    %c0 = arith.constant 0 : index
    %c0_0 = arith.constant 0 : index
    %0 = vector.load %arg1[%c0, %c0_0] : memref<8x12xf32, #tpu.memory_space<vmem>>, vector<8x12xf32>
    %1 = arith.truncf %0 : vector<8x12xf32> to vector<8x12xbf16>
    %c0_1 = arith.constant 0 : index
    %c0_2 = arith.constant 0 : index
    %2 = vector.load %arg2[%c0_1, %c0_2] : memref<12x256xbf16, #tpu.memory_space<vmem>>, vector<12x256xbf16>
    %cst = arith.constant dense<0.000000e+00> : vector<8x256xf32>
    %3 = tpu.matmul %1, %2, %cst {dimension_numbers = #tpu.dot_dimension_numbers<[1], [0], [0], [1], [0, 0, 1, 1], [], []>} : vector<8x12xbf16>, vector<12x256xbf16>, vector<8x256xf32> -> vector<8x256xf32>
    %c0_3 = arith.constant 0 : index
    %c0_4 = arith.constant 0 : index
    %4 = vector.load %arg3[%c0_3, %c0_4] : memref<1x256xf32, #tpu.memory_space<vmem>>, vector<1x256xf32>
    %5 = vector.broadcast %4 : vector<1x256xf32> to vector<8x256xf32>
    %6 = arith.addf %3, %5 : vector<8x256xf32>
    %cst_5 = arith.constant 0.000000e+00 : f32
    %7 = vector.broadcast %cst_5 : f32 to vector<8x256xf32>
    %8 = arith.maximumf %6, %7 : vector<8x256xf32>
    %9 = arith.truncf %8 : vector<8x256xf32> to vector<8x256xbf16>
    %c0_6 = arith.constant 0 : index
    %c0_7 = arith.constant 0 : index
    %10 = vector.load %arg4[%c0_6, %c0_7] : memref<256x64xbf16, #tpu.memory_space<vmem>>, vector<256x64xbf16>
    %cst_8 = arith.constant dense<0.000000e+00> : vector<8x64xf32>
    %11 = tpu.matmul %9, %10, %cst_8 {dimension_numbers = #tpu.dot_dimension_numbers<[1], [0], [0], [1], [0, 0, 1, 1], [], []>} : vector<8x256xbf16>, vector<256x64xbf16>, vector<8x64xf32> -> vector<8x64xf32>
    %c0_9 = arith.constant 0 : index
    %c0_10 = arith.constant 0 : index
    %12 = vector.load %arg5[%c0_9, %c0_10] : memref<1x64xf32, #tpu.memory_space<vmem>>, vector<1x64xf32>
    %13 = vector.broadcast %12 : vector<1x64xf32> to vector<8x64xf32>
    %14 = arith.addf %11, %13 : vector<8x64xf32>
    %cst_11 = arith.constant 0.000000e+00 : f32
    %15 = vector.broadcast %cst_11 : f32 to vector<8x64xf32>
    %16 = arith.maximumf %14, %15 : vector<8x64xf32>
    %17 = arith.truncf %16 : vector<8x64xf32> to vector<8x64xbf16>
    %c0_12 = arith.constant 0 : index
    %c0_13 = arith.constant 0 : index
    %18 = vector.load %arg6[%c0_12, %c0_13] : memref<64x2xbf16, #tpu.memory_space<vmem>>, vector<64x2xbf16>
    %cst_14 = arith.constant dense<0.000000e+00> : vector<8x2xf32>
    %19 = tpu.matmul %17, %18, %cst_14 {dimension_numbers = #tpu.dot_dimension_numbers<[1], [0], [0], [1], [0, 0, 1, 1], [], []>} : vector<8x64xbf16>, vector<64x2xbf16>, vector<8x2xf32> -> vector<8x2xf32>
    %c0_15 = arith.constant 0 : index
    %c0_16 = arith.constant 0 : index
    %20 = vector.load %arg7[%c0_15, %c0_16] : memref<1x2xf32, #tpu.memory_space<vmem>>, vector<1x2xf32>
    %21 = vector.broadcast %20 : vector<1x2xf32> to vector<8x2xf32>
    %22 = arith.addf %19, %21 : vector<8x2xf32>
    %c0_17 = arith.constant 0 : index
    %c0_18 = arith.constant 0 : index
    %23 = vector.load %arg8[%c0_17, %c0_18] : memref<8x2xf32, #tpu.memory_space<vmem>>, vector<8x2xf32>
    tpu.vector_store %arg8[%c0_17, %c0_18], %22 {strides = array<i32>} : memref<8x2xf32, #tpu.memory_space<vmem>>, vector<8x2xf32>,
    return
  }
  func.func @transform_0(%arg0: i32) -> (i32, i32) {
    %c0_i32 = arith.constant 0 : i32
    %c0_i32_0 = arith.constant 0 : i32
    return %arg0, %c0_i32 : i32, i32
  }
  func.func @transform_1(%arg0: i32) -> (i32, i32) {
    %c0_i32 = arith.constant 0 : i32
    %c0_i32_0 = arith.constant 0 : i32
    %c0_i32_1 = arith.constant 0 : i32
    return %c0_i32, %c0_i32_0 : i32, i32
  }
  func.func @transform_2(%arg0: i32) -> (i32, i32) {
    %c0_i32 = arith.constant 0 : i32
    %c0_i32_0 = arith.constant 0 : i32
    %c0_i32_1 = arith.constant 0 : i32
    return %c0_i32, %c0_i32_0 : i32, i32
  }
  func.func @transform_3(%arg0: i32) -> (i32, i32) {
    %c0_i32 = arith.constant 0 : i32
    %c0_i32_0 = arith.constant 0 : i32
    %c0_i32_1 = arith.constant 0 : i32
    return %c0_i32, %c0_i32_0 : i32, i32
  }
  func.func @transform_4(%arg0: i32) -> (i32, i32) {
    %c0_i32 = arith.constant 0 : i32
    %c0_i32_0 = arith.constant 0 : i32
    %c0_i32_1 = arith.constant 0 : i32
    return %c0_i32, %c0_i32_0 : i32, i32
  }
  func.func @transform_5(%arg0: i32) -> (i32, i32) {
    %c0_i32 = arith.constant 0 : i32
    %c0_i32_0 = arith.constant 0 : i32
    %c0_i32_1 = arith.constant 0 : i32
    return %c0_i32, %c0_i32_0 : i32, i32
  }
  func.func @transform_6(%arg0: i32) -> (i32, i32) {
    %c0_i32 = arith.constant 0 : i32
    %c0_i32_0 = arith.constant 0 : i32
    %c0_i32_1 = arith.constant 0 : i32
    return %c0_i32, %c0_i32_0 : i32, i32
  }
  func.func @transform_7(%arg0: i32) -> (i32, i32) {
    %c0_i32 = arith.constant 0 : i32
    %c0_i32_0 = arith.constant 0 : i32
    return %arg0, %c0_i32 : i32, i32
  }
}

</mosaic_0001>

<bundles_post_ra>
// kernel: tpu_custom_call.1
= control target key start
LH: loop header
LB: loop body
LE: loop exit
PB: predicated region body
PF: predicated region fallthrough
CT: control target
= control target key end

     0   :  { %vm49_vm0 = vcmask 1045504   ;;  %vm45_vm1 = vcmask 97280   ;;  %vm282_vm2 = vcmask 523264   ;;  %vm299_vm3 = vcmask 15360   ;;  %s549_s1 = inlined_call_operand.vmem [shape: bf16[12,256], index: 1, kind: input, shape index: {}]   ;;  %s550_s0 = inlined_call_operand.vmem [shape: f32[8,12], index: 0, kind: input, shape index: {}]   ;;  %s551_s3 = inlined_call_operand.vmem [shape: bf16[256,64], index: 3, kind: input, shape index: {}]   ;;  %s552_s4 = inlined_call_operand.vmem [shape: f32[1,64], index: 4, kind: input, shape index: {}]   ;;  %s553_s5 = inlined_call_operand.vmem [shape: bf16[64,2], index: 5, kind: input, shape index: {}]   ;;  %s554_s2 = inlined_call_operand.vmem [shape: f32[1,256], index: 2, kind: input, shape index: {}]   ;;  %s555_s6 = inlined_call_operand.vmem [shape: f32[1,2], index: 6, kind: input, shape index: {}]   ;;  %s556_s7 = inlined_call_operand.vmem [shape: f32[8,2], index: 7, kind: output, shape index: {}]  }
   0x1   :  { %v307_v0 = vld [vmem:[%s549_s1] sm:$0xf]  ;;  %v397_v1 = vld [vmem:[%s549_s1 + $0x4] sm:$0x30]  ;;  %v396_v2 = vld [vmem:[%s549_s1 + $0x4] sm:$0xf] }
   0x2   :  { %v308_v3 = vor.u32 %v397_v1, %v307_v0  ;;  %v309_v4 = vld [vmem:[%s549_s1 + $0x8] sm:$0x30]  ;;  %v27_v5 = vld [vmem:[%s550_s0] sm:$0xff]  ;;  %v405_v6 = vld [vmem:[%s551_s3 + $0x38] sm:$0xff] }
   0x3   :  { %v312_v7 = vor.u32 %v396_v2, %v309_v4  ;;  %v413_v8 = vld [vmem:[%s551_s3 + $0x78] sm:$0xff]  ;;  %v28_v10 = vpack.c.bf16 %v27_v5, %v27_v5  ;;  %218 = vmatpush.bf16.msra.mxu2 %v405_v6  ;;  %v404_v11 = vld [vmem:[%s551_s3 + $0x30] sm:$0xff]  ;;  %v403_v14 = vld [vmem:[%s551_s3 + $0x28] sm:$0xff] }
   0x4   :  { %v51_v9 = vsel %vm49_vm0, %v308_v3, 0  ;;  %231 = vmatpush.bf16.msra.mxu3 %v413_v8  ;;  %v412_v13 = vld [vmem:[%s551_s3 + $0x70] sm:$0xff]  ;;  %v411_v15 = vld [vmem:[%s551_s3 + $0x68] sm:$0xff]  ;;  %v402_v16 = vld [vmem:[%s551_s3 + $0x20] sm:$0xff] }
   0x5   :  { %63 = vmatpush.bf16.msra.mxu0 %v51_v9  ;;  %v54_v12 = vsel %vm49_vm0, %v312_v7, 0  ;;  %v410_v17 = vld [vmem:[%s551_s3 + $0x60] sm:$0xff]  ;;  %v401_v18 = vld [vmem:[%s551_s3 + $0x18] sm:$0xff]  ;;  %v400_v20 = vld [vmem:[%s551_s3 + $0x10] sm:$0xff] }
   0x6   :  { %76 = vmatpush.bf16.msra.mxu1 %v54_v12  ;;  %v409_v19 = vld [vmem:[%s551_s3 + $0x58] sm:$0xff]  ;;  %v408_v21 = vld [vmem:[%s551_s3 + $0x50] sm:$0xff]  ;;  %v399_v22 = vld [vmem:[%s551_s3 + $0x8] sm:$0xff] }
   0x7   :  { %219 = vmatpush.bf16.msra.mxu2 %v404_v11  ;;  %v407_v23 = vld [vmem:[%s551_s3 + $0x48] sm:$0xff]  ;;  %v398_v24 = vld [vmem:[%s551_s3] sm:$0xff]  ;;  %v417_v26 = vld [vmem:[%s553_s5 + $0x18] sm:$0xff] }
   0x8   :  { %313 = vmatmul.msk.bf16.vlgmr.msra.gmra.mxu0 %vm45_vm1, %v28_v10  ;;  %232 = vmatpush.bf16.msra.mxu3 %v412_v13  ;;  %v406_v25 = vld [vmem:[%s551_s3 + $0x40] sm:$0xff]  ;;  %v416_v27 = vld [vmem:[%s553_s5 + $0x10] sm:$0xff]  ;;  %v415_v41 = vld [vmem:[%s553_s5 + $0x8] sm:$0xff] }
   0x9   :  { %314 = vmatmul.msk.bf16.vlgmr.msra.gmra.mxu1 %vm45_vm1, %v28_v10  ;;  %290 = vmatpush.bf16.msrb.mxu0 %v417_v26  ;;  %v31_v28 = vld [vmem:[%s554_s2] sm:$0x3] }
   0xa   :  { %v33_v29 = vperm.slane %v31_v28, 0  ;;  %v34_v30 = vperm.slane %v31_v28, 1  ;;  %v414_v42 = vld [vmem:[%s553_s5] sm:$0xff] }
   0xb   :  { %220 = vmatpush.bf16.msra.mxu2 %v403_v14  ;;  %v418_v43 = vld [vmem:[%s552_s4] ss:$0 sm:$0xff] }
   0xc   :  { %233 = vmatpush.bf16.msra.mxu3 %v411_v15  ;;  %v419_v52 = vld [vmem:[%s555_s6] ss:$0 sm:$0xff] }
   0xd   :  { %291 = vmatpush.bf16.msrb.mxu0 %v416_v27 }
   0xf   :  { %221 = vmatpush.bf16.msra.mxu2 %v402_v16 }
  0x10   :  { %234 = vmatpush.bf16.msra.mxu3 %v410_v17 }
  0x11   :  { %292 = vmatpush.bf16.msrb.mxu0 %v415_v41 }
  0x13   :  { %222 = vmatpush.bf16.msra.mxu2 %v401_v18 }
  0x14   :  { %235 = vmatpush.bf16.msra.mxu3 %v409_v19 }
  0x15   :  { %293 = vmatpush.bf16.msrb.mxu0 %v414_v42 }
  0x17   :  { %223 = vmatpush.bf16.msra.mxu2 %v400_v20 }
  0x18   :  { %236 = vmatpush.bf16.msra.mxu3 %v408_v21 }
  0x1b   :  { %224 = vmatpush.bf16.msra.mxu2 %v399_v22 }
  0x1c   :  { %237 = vmatpush.bf16.msra.mxu3 %v407_v23 }
  0x1f   :  { %225 = vmatpush.bf16.msra.mxu2 %v398_v24 }
  0x20   :  { %238 = vmatpush.bf16.msra.mxu3 %v406_v25 }
  0x85   :  { %v65_v31 = vpop.f32.mrf.mxu0 }
  0x86   :  { %v66_v32 = vadd.f32 %v65_v31, %v33_v29  ;;  %v78_v33 = vpop.f32.mrf.mxu1 }
  0x87   :  { %v79_v34 = vadd.f32 %v78_v33, %v34_v30 }
  0x88   :  { %v82_v35 = vmax.f32 %v66_v32, 0.0 }
  0x89   :  { %v83_v36 = vmax.f32 %v79_v34, 0.0 }
  0x8a   :  { %v84_v37 = vpack.c.bf16 %v82_v35, %v82_v35 }
  0x8b   :  { %v85_v38 = vpack.c.bf16 %v83_v36, %v83_v36 }
  0x8c   :  { %226 = vmatmul.bf16.vlgmr.msra.gmra.mxu2 %v84_v37 }
  0x8d   :  { %239 = vmatmul.bf16.vlgmr.msra.gmra.mxu3 %v85_v38  ;;  %v67_v39 = vpop.f32.mrf.mxu0 }
  0x8e   :  { %v80_v40 = vpop.f32.mrf.mxu1 }
 0x10f   :  { %v227_v44 = vpop.f32.mrf.mxu2 }
 0x110   :  { %v228_v45 = vadd.f32 %v418_v43, %v227_v44  ;;  %v240_v46 = vpop.f32.mrf.mxu3 }
 0x112   :  { %v241_v47 = vadd.f32 %v240_v46, %v228_v45 }
 0x114   :  { %v244_v48 = vmax.f32 %v241_v47, 0.0 }
 0x116   :  { %v245_v49 = vpack.c.bf16 %v244_v48, %v244_v48 }
 0x117   :  { %v229_v50 = vpop.f32.mrf.mxu2 }
 0x118   :  { %v242_v51 = vpop.f32.mrf.mxu3  ;;  %395 = vmatmul.msk.bf16.vlgmr.msrb.gmra.mxu0 %vm282_vm2, %v245_v49 }
 0x195   :  { %v295_v53 = vpop.f32.mrf.mxu0 }
 0x196   :  { %v296_v54 = vadd.f32 %v419_v52, %v295_v53 }
 0x198   :  { %300 = vst.msk [vmem:[%s556_s7] sm:$0xff] %vm299_vm3, %v296_v54 }
 0x19d   :  { %v297_v55 = vpop.f32.mrf.mxu0 }

</bundles_post_ra>
